<compile_context>
chip_gen: v7x
topology: tpu7x:2x2x1
jax: 0.10.0
libtpu: 0.0.40
codegen_flags: <defaults>
</compile_context>

<pallas_src>
import numpy as np
import jax
import jax.numpy as jnp
from jax.experimental import pallas as pl
from jax.experimental.pallas import tpu as pltpu

POOL_SCALES = (1, 2, 3, 6)
BN_EPS = 1e-5


# ---------------------------------------------------------------------------
# Exact adaptive-avg-pool / bilinear-upsample linear operators (host, numpy)
# ---------------------------------------------------------------------------
def _adaptive_pool_matrix_np(in_size, out_size):
    """A[i, h] such that pooled = A @ x reproduces nn.AdaptiveAvgPool2d (1-D)."""
    A = np.zeros((out_size, in_size), dtype=np.float32)
    for i in range(out_size):
        start = (i * in_size) // out_size
        end = -(-((i + 1) * in_size) // out_size)  # ceil
        A[i, start:end] = 1.0 / (end - start)
    return A


def _bilinear_matrix_np(in_size, out_size):
    """L[h, i] for F.interpolate(mode='bilinear', align_corners=True) (1-D)."""
    L = np.zeros((out_size, in_size), dtype=np.float32)
    if in_size == 1:
        L[:, 0] = 1.0
        return L
    if out_size == 1:  # guard: single output sample with align_corners=True
        L[0, 0] = 1.0
        return L
    for h in range(out_size):
        src = h * (in_size - 1) / (out_size - 1)
        i0 = min(int(np.floor(src)), in_size - 1)
        i1 = min(i0 + 1, in_size - 1)
        w1 = src - i0
        L[h, i0] += 1.0 - w1
        L[h, i1] += w1
    return L


def pooling_operator(H, W, scales):
    """(P, H*W): row block for scale s is (Ah kron Aw); P = sum(s^2)."""
    return np.concatenate(
        [np.kron(_adaptive_pool_matrix_np(H, s), _adaptive_pool_matrix_np(W, s))
         for s in scales], axis=0)


def upsample_operator(H, W, scales):
    """(H*W, P): column block for scale s is (Lh kron Lw)."""
    return np.concatenate(
        [np.kron(_bilinear_matrix_np(s, H), _bilinear_matrix_np(s, W))
         for s in scales], axis=1)


def adaptive_pool_matrix(in_size, out_size):
    return jnp.asarray(_adaptive_pool_matrix_np(in_size, out_size))


def bilinear_upsample_matrix(in_size, out_size):
    return jnp.asarray(_bilinear_matrix_np(in_size, out_size))


# ---------------------------------------------------------------------------
# Pallas kernel 1: batched pyramid branches (one grid step per pool scale)
#   z_s = relu(pooled_s @ W_s + b_s) @ Wf_s
# Wf_s is the K-slice of the (BN-folded) final conv weight that this branch
# would have hit after concatenation.
# ---------------------------------------------------------------------------
def _stage_branch_kernel(p_ref, w_ref, b_ref, wf_ref, z_ref):
    h = jnp.dot(p_ref[...], w_ref[...], preferred_element_type=jnp.float32)
    h = jnp.maximum(h + b_ref[...], 0.0)
    z_ref[...] = jnp.dot(h.astype(jnp.bfloat16), wf_ref[...],
                         preferred_element_type=jnp.float32)


def stage_branches(pooled_packed, ws_packed, bs_packed, wf_packed):
    """pooled: (S, Rmax, Cin) bf16; ws: (S, Cin, Cmid) bf16; bs: (S, 1, Cmid) f32;
    wf: (S, Cmid, Cout) bf16 -> (S, Rmax, Cout) f32.
    Invariant: rows >= the real N*s*s count of slice s are zero padding; their
    outputs equal relu(bias_s) @ Wf_s garbage and MUST be sliced off by callers."""
    S, r_max, cin = pooled_packed.shape
    cmid = ws_packed.shape[2]
    cout = wf_packed.shape[2]
    return pl.pallas_call(
        _stage_branch_kernel,
        out_shape=jax.ShapeDtypeStruct((S, r_max, cout), jnp.float32),
        grid_spec=pltpu.PrefetchScalarGridSpec(
            num_scalar_prefetch=0,
            grid=(S,),
            in_specs=[
                pl.BlockSpec((None, r_max, cin), lambda s: (s, 0, 0)),
                pl.BlockSpec((None, cin, cmid), lambda s: (s, 0, 0)),
                pl.BlockSpec((None, 1, cmid), lambda s: (s, 0, 0)),
                pl.BlockSpec((None, cmid, cout), lambda s: (s, 0, 0)),
            ],
            out_specs=pl.BlockSpec((None, r_max, cout), lambda s: (s, 0, 0)),
        ),
        compiler_params=pltpu.CompilerParams(dimension_semantics=("parallel",)),
    )(pooled_packed, ws_packed, bs_packed, wf_packed)


# ---------------------------------------------------------------------------
# Pallas kernel 2: fused final conv + in-kernel branch upsample
#   out = relu(x @ Wf_x + U @ z_n + bias)
# x / Wf_x are bf16 (native MXU path, half the DMA bytes); U, z, bias and the
# accumulation / epilogue are f32.  The residual never touches HBM.
# ---------------------------------------------------------------------------
def _final_fused_kernel(x_ref, u_ref, z_ref, w_ref, b_ref, o_ref):
    acc = jnp.dot(x_ref[...], w_ref[...], preferred_element_type=jnp.float32)
    res = jnp.dot(u_ref[...], z_ref[...], preferred_element_type=jnp.float32)
    o_ref[...] = jnp.maximum(acc + res + b_ref[...], 0.0).astype(o_ref.dtype)


def _pick_block_rows(hw, target):
    """Largest multiple of 8 that divides hw and is <= target, so the streamed
    operands need no padding copies; falls back to a whole-image tile."""
    target = min(target, hw)
    for br in range(target - target % 8, 7, -8):
        if hw % br == 0:
            return br
    return hw


def final_fused(x_bf, up_op, z_all, w, bias, *, block_rows=512,
                out_dtype=jnp.float32, vmem_limit_bytes=None):
    """x_bf: (N, HW, Cin) bf16; up_op: (HW, P) f32; z_all: (N, P, Cout) f32;
    w: (Cin, Cout) bf16; bias: (1, Cout) f32 -> (N, HW, Cout) out_dtype."""
    N, HW, cin = x_bf.shape
    P = up_op.shape[1]
    cout = w.shape[1]
    br = _pick_block_rows(HW, block_rows)
    grid = (N, HW // br)
    cp = dict(dimension_semantics=("parallel", "parallel"))
    if vmem_limit_bytes is not None:
        cp["vmem_limit_bytes"] = vmem_limit_bytes
    return pl.pallas_call(
        _final_fused_kernel,
        out_shape=jax.ShapeDtypeStruct((N, HW, cout), out_dtype),
        grid_spec=pltpu.PrefetchScalarGridSpec(
            num_scalar_prefetch=0,
            grid=grid,
            in_specs=[
                pl.BlockSpec((None, br, cin), lambda n, i: (n, i, 0)),   # x rows (bf16)
                pl.BlockSpec((br, P), lambda n, i: (i, 0)),              # upsample rows
                pl.BlockSpec((None, P, cout), lambda n, i: (n, 0, 0)),   # branch proj z_n
                pl.BlockSpec((cin, cout), lambda n, i: (0, 0)),          # resident weight
                pl.BlockSpec((1, cout), lambda n, i: (0, 0)),            # bias
            ],
            out_specs=pl.BlockSpec((None, br, cout), lambda n, i: (n, i, 0)),
        ),
        compiler_params=pltpu.CompilerParams(**cp),
    )(x_bf, up_op, z_all, w, bias)


# ---------------------------------------------------------------------------
# Deterministic synthetic ConvModule params with BN (eval) folded into weights.
# ---------------------------------------------------------------------------
def make_convmodule_params(key, cin, cout):
    w = jax.random.normal(key, (cin, cout), jnp.float32) * 0.1   # conv weight.T
    idx = jnp.arange(cout, dtype=jnp.float32)
    gamma = 1.0 + 0.01 * idx
    beta = 0.02 * idx - 0.1
    running_mean = 0.005 * idx
    running_var = 1.0 + 0.03 * idx
    scale = gamma / jnp.sqrt(running_var + BN_EPS)
    w_folded = w * scale[None, :]                 # BN scale folded into weight
    bias = beta - running_mean * scale
    return w_folded, bias.reshape(1, cout)


# ---------------------------------------------------------------------------
# PPM forward (NCHW in / NCHW out, NHWC bf16 internally)
# ---------------------------------------------------------------------------
def ppm_forward(x, stage_params, final_params, *, block_rows=512,
                out_dtype=jnp.float32, vmem_limit_bytes=None):
    N, C, H, W = x.shape
    S = len(POOL_SCALES)
    HW = H * W
    cmid = stage_params[0][0].shape[1]
    wf, bf = final_params                    # (C + S*cmid, Cout) folded, (1, Cout)
    cout = wf.shape[1]
    offs = np.concatenate([[0], np.cumsum([s * s for s in POOL_SCALES])])

    # Single boundary layout change + bf16 cast; reused by pooling & final conv.
    x_bf = jnp.transpose(x, (0, 2, 3, 1)).astype(jnp.bfloat16).reshape(N, HW, C)

    # ---- one fused adaptive-avg-pool pass over x (all 4 scales at once) ----
    pool_op = jnp.asarray(pooling_operator(H, W, POOL_SCALES))           # (P, HW)
    pooled_all = jnp.einsum("ph,nhc->npc", pool_op.astype(jnp.bfloat16), x_bf,
                            preferred_element_type=jnp.float32)          # (N,P,C) f32

    # ---- pyramid branches: ConvModule + final-conv K-slice projection at s x s
    #      (upsampling commutes with the 1x1 conv, so only tiny (s*s, Cout)
    #      projections are produced; the final kernel consumes them in-VMEM). ----
    r_max = N * max(POOL_SCALES) ** 2
    pooled_rows = []
    for k, s in enumerate(POOL_SCALES):
        p = pooled_all[:, offs[k]:offs[k + 1], :].reshape(N * s * s, C)
        pooled_rows.append(jnp.pad(p, ((0, r_max - N * s * s), (0, 0))))
    pooled_packed = jnp.stack(pooled_rows).astype(jnp.bfloat16)          # (S,Rmax,C)
    ws_packed = jnp.stack([w for w, _ in stage_params]).astype(jnp.bfloat16)
    bs_packed = jnp.stack([b for _, b in stage_params])                  # (S,1,cmid) f32
    wf_packed = jnp.stack(
        [wf[C + k * cmid: C + (k + 1) * cmid] for k in range(S)]
    ).astype(jnp.bfloat16)                                               # (S,cmid,Cout)

    z_packed = stage_branches(pooled_packed, ws_packed, bs_packed, wf_packed)
    # Padded rows of z_packed are garbage -> always slice to the real row count.
    z_all = jnp.concatenate(
        [z_packed[k, :N * s * s].reshape(N, s * s, cout)
         for k, s in enumerate(POOL_SCALES)], axis=1)                    # (N,P,Cout)

    # ---- fused final conv: relu(x @ Wf_x + U @ z + bias); residual built in-kernel
    up_op = jnp.asarray(upsample_operator(H, W, POOL_SCALES))            # (HW, P) f32
    out = final_fused(x_bf, up_op, z_all, wf[:C].astype(jnp.bfloat16), bf,
                      block_rows=block_rows, out_dtype=out_dtype,
                      vmem_limit_bytes=vmem_limit_bytes)                 # (N,HW,Cout)
    return jnp.transpose(out.reshape(N, H, W, cout), (0, 3, 1, 2))       # NCHW


# ---------------------------------------------------------------------------
# Pure-JAX f32 reference of the ORIGINAL (concat-then-conv) formulation.
# ---------------------------------------------------------------------------
def ppm_reference(x, stage_params, final_params):
    N, C, H, W = x.shape
    xn = jnp.transpose(x, (0, 2, 3, 1))
    outs = [xn]
    for s, (w, b) in zip(POOL_SCALES, stage_params):
        Ah = adaptive_pool_matrix(H, s)
        Aw = adaptive_pool_matrix(W, s)
        pooled = jnp.einsum('ih,jw,nhwc->nijc', Ah, Aw, xn)
        y = jnp.maximum(pooled.reshape(-1, C) @ w + b, 0.0).reshape(N, s, s, -1)
        Lh = bilinear_upsample_matrix(s, H)
        Lw = bilinear_upsample_matrix(s, W)
        outs.append(jnp.einsum('hi,wj,nijc->nhwc', Lh, Lw, y))
    cat = jnp.concatenate(outs, axis=-1)
    wf, bf = final_params
    out = jnp.maximum(cat.reshape(-1, cat.shape[-1]) @ wf + bf, 0.0)
    return jnp.transpose(out.reshape(N, H, W, -1), (0, 3, 1, 2))


# ---------------------------------------------------------------------------
if __name__ == "__main__":
    N, C_IN, H, W = 2, 4, 16, 16
    # Small stand-in for the default 256.  NOTE: for benchmarking use a Cout
    # that is a multiple of 128 so the output store path is lane-dense
    # (sub-128 lanes trigger masked partial stores and do not extrapolate).
    OUT_CHANNELS = 32

    key = jax.random.PRNGKey(0)
    kx, *kconv = jax.random.split(key, 2 + len(POOL_SCALES))
    x = jax.random.normal(kx, (N, C_IN, H, W), jnp.float32)

    stage_params = [make_convmodule_params(k, C_IN, OUT_CHANNELS) for k in kconv[:-1]]
    c_total = C_IN + len(POOL_SCALES) * OUT_CHANNELS
    final_params = make_convmodule_params(kconv[-1], c_total, OUT_CHANNELS)

    # block_rows=128 -> grid (N=2, HW/128=2): multi-step, even (v7x 2-TC friendly),
    # and no padding since 128 divides H*W.  At production sizes use 512-1024 on
    # v5e/v6e (raise vmem_limit_bytes past 512 rows) and <=512 on v7x.
    out = ppm_forward(x, stage_params, final_params, block_rows=128)
    out = jax.block_until_ready(out)
    assert out.shape == (N, OUT_CHANNELS, H, W), out.shape

    # Cross-check against the straightforward f32 concat-then-conv reference.
    # Tolerance covers bf16 rounding of the matmul operands along the whole
    # pipeline (x, pooling operator, stage weights, final weight).
    ref = jax.block_until_ready(ppm_reference(x, stage_params, final_params))
    np.testing.assert_allclose(np.asarray(out), np.asarray(ref), rtol=2e-2, atol=2e-2)

    print("KERNEL_OK")
</pallas_src>

<mosaic_0001>
module attributes {stable_mosaic.version = 11 : i64} {
  func.func @_stage_branch_kernel(%arg0: i32, %arg1: memref<1x72x4xbf16, #tpu.memory_space<vmem>>, %arg2: memref<1x4x32xbf16, #tpu.memory_space<vmem>>, %arg3: memref<1x1x32xf32, #tpu.memory_space<vmem>>, %arg4: memref<1x32x32xbf16, #tpu.memory_space<vmem>>, %arg5: memref<1x72x32xf32, #tpu.memory_space<vmem>>) attributes {dimension_semantics = [#tpu.dimension_semantics<parallel>], iteration_bounds = array<i64: 4>, scalar_prefetch = 0 : i64, scratch_operands = 0 : i64, tpu.core_type = #tpu.core_type<tc>, window_params = [{transform_indices = @transform_0, window_bounds = array<i64: 1, 72, 4>}, {transform_indices = @transform_1, window_bounds = array<i64: 1, 4, 32>}, {transform_indices = @transform_2, window_bounds = array<i64: 1, 1, 32>}, {transform_indices = @transform_3, window_bounds = array<i64: 1, 32, 32>}, {transform_indices = @transform_4, window_bounds = array<i64: 1, 72, 32>}]} {
    %c0 = arith.constant 0 : index
    %c0_0 = arith.constant 0 : index
    %c0_1 = arith.constant 0 : index
    %0 = vector.load %arg1[%c0, %c0_0, %c0_1] : memref<1x72x4xbf16, #tpu.memory_space<vmem>>, vector<1x72x4xbf16>
    %1 = vector.shape_cast %0 : vector<1x72x4xbf16> to vector<72x4xbf16>
    %c0_2 = arith.constant 0 : index
    %c0_3 = arith.constant 0 : index
    %c0_4 = arith.constant 0 : index
    %2 = vector.load %arg2[%c0_2, %c0_3, %c0_4] : memref<1x4x32xbf16, #tpu.memory_space<vmem>>, vector<1x4x32xbf16>
    %3 = vector.shape_cast %2 : vector<1x4x32xbf16> to vector<4x32xbf16>
    %cst = arith.constant dense<0.000000e+00> : vector<72x32xf32>
    %4 = tpu.matmul %1, %3, %cst {dimension_numbers = #tpu.dot_dimension_numbers<[1], [0], [0], [1], [0, 0, 1, 1], [], []>} : vector<72x4xbf16>, vector<4x32xbf16>, vector<72x32xf32> -> vector<72x32xf32>
    %c0_5 = arith.constant 0 : index
    %c0_6 = arith.constant 0 : index
    %c0_7 = arith.constant 0 : index
    %5 = vector.load %arg3[%c0_5, %c0_6, %c0_7] : memref<1x1x32xf32, #tpu.memory_space<vmem>>, vector<1x1x32xf32>
    %6 = vector.shape_cast %5 : vector<1x1x32xf32> to vector<1x32xf32>
    %7 = vector.broadcast %6 : vector<1x32xf32> to vector<72x32xf32>
    %8 = arith.addf %4, %7 : vector<72x32xf32>
    %cst_8 = arith.constant 0.000000e+00 : f32
    %9 = vector.broadcast %cst_8 : f32 to vector<72x32xf32>
    %10 = arith.maximumf %8, %9 : vector<72x32xf32>
    %11 = arith.truncf %10 : vector<72x32xf32> to vector<72x32xbf16>
    %c0_9 = arith.constant 0 : index
    %c0_10 = arith.constant 0 : index
    %c0_11 = arith.constant 0 : index
    %12 = vector.load %arg4[%c0_9, %c0_10, %c0_11] : memref<1x32x32xbf16, #tpu.memory_space<vmem>>, vector<1x32x32xbf16>
    %13 = vector.shape_cast %12 : vector<1x32x32xbf16> to vector<32x32xbf16>
    %cst_12 = arith.constant dense<0.000000e+00> : vector<72x32xf32>
    %14 = tpu.matmul %11, %13, %cst_12 {dimension_numbers = #tpu.dot_dimension_numbers<[1], [0], [0], [1], [0, 0, 1, 1], [], []>} : vector<72x32xbf16>, vector<32x32xbf16>, vector<72x32xf32> -> vector<72x32xf32>
    %c0_13 = arith.constant 0 : index
    %c0_14 = arith.constant 0 : index
    %c0_15 = arith.constant 0 : index
    %15 = vector.load %arg5[%c0_13, %c0_14, %c0_15] : memref<1x72x32xf32, #tpu.memory_space<vmem>>, vector<1x72x32xf32>
    %16 = vector.shape_cast %15 : vector<1x72x32xf32> to vector<72x32xf32>
    %17 = vector.shape_cast %14 : vector<72x32xf32> to vector<1x72x32xf32>
    tpu.vector_store %arg5[%c0_13, %c0_14, %c0_15], %17 {strides = array<i32>} : memref<1x72x32xf32, #tpu.memory_space<vmem>>, vector<1x72x32xf32>,
    return
  }
  func.func @transform_0(%arg0: i32) -> (i32, i32, i32) {
    %c0_i32 = arith.constant 0 : i32
    %c0_i32_0 = arith.constant 0 : i32
    %c0_i32_1 = arith.constant 0 : i32
    return %arg0, %c0_i32, %c0_i32_0 : i32, i32, i32
  }
  func.func @transform_1(%arg0: i32) -> (i32, i32, i32) {
    %c0_i32 = arith.constant 0 : i32
    %c0_i32_0 = arith.constant 0 : i32
    %c0_i32_1 = arith.constant 0 : i32
    return %arg0, %c0_i32, %c0_i32_0 : i32, i32, i32
  }
  func.func @transform_2(%arg0: i32) -> (i32, i32, i32) {
    %c0_i32 = arith.constant 0 : i32
    %c0_i32_0 = arith.constant 0 : i32
    %c0_i32_1 = arith.constant 0 : i32
    return %arg0, %c0_i32, %c0_i32_0 : i32, i32, i32
  }
  func.func @transform_3(%arg0: i32) -> (i32, i32, i32) {
    %c0_i32 = arith.constant 0 : i32
    %c0_i32_0 = arith.constant 0 : i32
    %c0_i32_1 = arith.constant 0 : i32
    return %arg0, %c0_i32, %c0_i32_0 : i32, i32, i32
  }
  func.func @transform_4(%arg0: i32) -> (i32, i32, i32) {
    %c0_i32 = arith.constant 0 : i32
    %c0_i32_0 = arith.constant 0 : i32
    %c0_i32_1 = arith.constant 0 : i32
    return %arg0, %c0_i32, %c0_i32_0 : i32, i32, i32
  }
}

</mosaic_0001>

<bundles_post_ra>
// kernel: tpu_custom_call.1
= control target key start
LH: loop header
LB: loop body
LE: loop exit
PB: predicated region body
PF: predicated region fallthrough
CT: control target
= control target key end

     0   :  { %s741_s15 = smov 0   ;;  %s811_s0 = inlined_call_operand.vmem [shape: bf16[4,72,4], index: 0, kind: input, shape index: {}]   ;;  %s812_s1 = inlined_call_operand.vmem [shape: bf16[4,4,32], index: 1, kind: input, shape index: {}]   ;;  %s813_s2 = inlined_call_operand.vmem [shape: f32[4,1,32], index: 2, kind: input, shape index: {}]   ;;  %s814_s3 = inlined_call_operand.vmem [shape: bf16[4,32,32], index: 3, kind: input, shape index: {}]   ;;  %s815_s4 = inlined_call_operand.vmem [shape: f32[4,72,32], index: 4, kind: output, shape index: {}]  }
   0x1 LB: > { %s597_s16 = sadd.s32 4294967295, %s712_s15   ;;  %p601_p0 = scmp.ge.s32.totalorder %s712_s15, 1  ;;  %s712_s15 = sphi %s741_s15, %s14_s15  }
   0x2   : > { %p189_p1 = scmp.lt.s32.totalorder %s712_s15, 5 }
   0x4   : > { %p190_p2 = pnand %p601_p0, %p189_p1 }
   0x5   : > { %p227_p3 = scmp.lt.s32.totalorder (!%p190_p2), %s597_s16, 3  ;;  %v714_v0 = vmov (!%p190_p2), 0.0   ;;  %vm715_vm0 = vmmov (!%p190_p2), 0   ;;  %vm306_vm1 = vcmask (!%p190_p2), 1041408   ;;  %vm290_vm2 = vcmask (!%p190_p2), 31744  }
   0x6   : > { %193 = sbr.rel (%p190_p2) target bundleno = 488 (0x1e8), region = 36  ;;  %641 = vmatprep.subr.bf16.mxu0 (!%p190_p2), %v714_v0  ;;  %643 = vmatprep.mubr.msk.bf16.mxu0 (!%p190_p2), %vm715_vm0, %v714_v0  ;;  %vm412_vm3 = vcmask (!%p190_p2), 261120  }
   0x7   : > { %663 = vmatprep.subr.bf16.mxu1 (!%p190_p2), %v714_v0  ;;  %667 = vmatprep.mubr.msk.bf16.mxu1 (!%p190_p2), %vm715_vm0, %v714_v0 }
   0xd   : > { %s817_s16 = smov (!%p227_p3, %s597_s16), 3 }
   0xe   : > { %s687_s17 = smul.u32 36, %s817_s16  ;;  %s603_s18 = sshll.u32 %s817_s16, 1 }
   0xf   : > { %s235_s21 = scalar_lea.vmem %s812_s1, %s603_s18  ;;  %s627_s25 = sshll.u32 %s817_s16, 4 }
  0x10   : > { %s231_s24 = scalar_lea.vmem %s811_s0, %s687_s17  ;;  %v259_v1 = vld [vmem:[%s235_s21] sm:$0x3]  ;;  %s243_s28 = scalar_lea.vmem %s814_s3, %s627_s25 }
  0x11   : > { %v308_v2 = vsel %vm306_vm1, %v259_v1, 0  ;;  %v699_v3 = vld [vmem:[%s231_s24] sm:$0xff]   ;;  %v700_v4 = vld [vmem:[%s231_s24 + $0x8] sm:$0xff]   ;;  %v701_v5 = vld [vmem:[%s231_s24 + $0x10] sm:$0xff]   ;;  %s238_s5 = scalar_lea.vmem %s813_s2, %s817_s16  ;;  %s688_s6 = smul.u32 72, %s817_s16 }
  0x12   : > { %642 = vmatpush3.bf16.msra.mxu0 %v308_v2  ;;  %v702_v6 = vld [vmem:[%s231_s24 + $0x18] sm:$0xff]   ;;  %v703_v7 = vld [vmem:[%s231_s24 + $0x20] ss:$0 sps:$4 sm:$0xff]   ;;  %v705_v9 = vld [vmem:[%s243_s28 + $0x8] sm:$0xff]  }
  0x13   : > { %v704_v8 = vld [vmem:[%s243_s28] sm:$0xff]   ;;  %s248_s9 = scalar_lea.vmem %s815_s4, %s688_s6 }
  0x14   : > { %664 = vmatpush3.bf16.msra.mxu1 %v704_v8  ;;  %v607_v10 = vld [vmem:[%s238_s5] ss:$0 sm:$0xff] }
  0x15   : > { %644 = vmatmul.mubr.msk.bf16.vlgmr.msra.gmra.mrb[0].mxu0 %vm290_vm2, %v699_v3  ;;  %665 = vmatprep.subr.bf16.mxu1 %v714_v0 }
  0x16   : > { %647 = vmatprep.mubr.msk.bf16.mxu0 %vm715_vm0, %v714_v0 }
  0x18   : > { %666 = vmatpush3.bf16.msra.mxu1 %v705_v9 }
  0x1d   : > { %648 = vmatmul.mubr.msk.bf16.gmra.mrb[4].mxu0 %vm290_vm2, %v700_v4 }
  0x1e   : > { %651 = vmatprep.mubr.msk.bf16.mxu0 %vm715_vm0, %v714_v0 }
  0x25   : > { %652 = vmatmul.mubr.msk.bf16.gmra.mrb[8].mxu0 %vm290_vm2, %v701_v5 }
  0x26   : > { %655 = vmatprep.mubr.msk.bf16.mxu0 %vm715_vm0, %v714_v0 }
  0x2d   : > { %656 = vmatmul.mubr.msk.bf16.gmra.mrb[12].mxu0 %vm290_vm2, %v702_v6 }
  0x2e   : > { %659 = vmatprep.mubr.msk.bf16.mxu0 %vm715_vm0, %v714_v0 }
  0x35   : > { %660 = vmatmul.mubr.msk.bf16.gmra.mrb[16].mxu0 %vm290_vm2, %v703_v7 }
  0xe8   : > { %v344_v11 = vpop.f32.mrb[0].mxu0 }
  0xe9   : > { %v345_v12 = vadd.f32 %v607_v10, %v344_v11  ;;  %v645_v13 = vpop.f32.mrb[1].mxu0 }
  0xea   : > { %v347_v14 = vpop.f32.mrb[2].mxu0 }
  0xeb   : > { %v348_v15 = vadd.f32 %v607_v10, %v347_v14  ;;  %v646_v16 = vpop.f32.mrb[3].mxu0  ;;  %v382_v17 = vmax.f32 %v345_v12, 0.0 }
  0xed   : > { %v383_v18 = vmax.f32 %v348_v15, 0.0 }
  0xef   : > { %v391_v19 = vpack.c.bf16 %v383_v18, %v382_v17 }
  0xf0   : > { %v352_v20 = vpop.f32.mrb[4].mxu0 }
  0xf1   : > { %v353_v21 = vadd.f32 %v607_v10, %v352_v20  ;;  %v649_v22 = vpop.f32.mrb[5].mxu0  ;;  %668 = vmatmul.mubr.msk.bf16.vlgmr.msra.gmra.mrb[0].mxu1 %vm412_vm3, %v391_v19 }
  0xf2   : > { %v355_v23 = vpop.f32.mrb[6].mxu0  ;;  %671 = vmatprep.mubr.msk.bf16.mxu1 %vm715_vm0, %v714_v0 }
  0xf3   : > { %v356_v24 = vadd.f32 %v607_v10, %v355_v23  ;;  %v650_v25 = vpop.f32.mrb[7].mxu0  ;;  %v384_v26 = vmax.f32 %v353_v21, 0.0 }
  0xf5   : > { %v385_v27 = vmax.f32 %v356_v24, 0.0 }
  0xf7   : > { %v392_v28 = vpack.c.bf16 %v385_v27, %v384_v26 }
  0xf8   : > { %v360_v29 = vpop.f32.mrb[8].mxu0 }
  0xf9   : > { %v361_v30 = vadd.f32 %v607_v10, %v360_v29  ;;  %v653_v31 = vpop.f32.mrb[9].mxu0  ;;  %672 = vmatmul.mubr.msk.bf16.gmra.mrb[4].mxu1 %vm412_vm3, %v392_v28 }
  0xfa   : > { %v363_v32 = vpop.f32.mrb[10].mxu0  ;;  %675 = vmatprep.mubr.msk.bf16.mxu1 %vm715_vm0, %v714_v0 }
  0xfb   : > { %v364_v33 = vadd.f32 %v607_v10, %v363_v32  ;;  %v654_v34 = vpop.f32.mrb[11].mxu0  ;;  %v386_v35 = vmax.f32 %v361_v30, 0.0 }
  0xfd   : > { %v387_v36 = vmax.f32 %v364_v33, 0.0 }
  0xff   : > { %v393_v37 = vpack.c.bf16 %v387_v36, %v386_v35 }
 0x100   : > { %v368_v38 = vpop.f32.mrb[12].mxu0 }
 0x101   : > { %v369_v39 = vadd.f32 %v607_v10, %v368_v38  ;;  %v657_v40 = vpop.f32.mrb[13].mxu0  ;;  %676 = vmatmul.mubr.msk.bf16.gmra.mrb[8].mxu1 %vm412_vm3, %v393_v37 }
 0x102   : > { %v371_v41 = vpop.f32.mrb[14].mxu0  ;;  %679 = vmatprep.mubr.msk.bf16.mxu1 %vm715_vm0, %v714_v0 }
 0x103   : > { %v372_v42 = vadd.f32 %v607_v10, %v371_v41  ;;  %v658_v43 = vpop.f32.mrb[15].mxu0  ;;  %v388_v44 = vmax.f32 %v369_v39, 0.0 }
 0x105   : > { %v389_v45 = vmax.f32 %v372_v42, 0.0 }
 0x107   : > { %v394_v46 = vpack.c.bf16 %v389_v45, %v388_v44 }
 0x108   : > { %v376_v47 = vpop.f32.mrb[16].mxu0 }
 0x109   : > { %v377_v48 = vadd.f32 %v607_v10, %v376_v47  ;;  %v661_v49 = vpop.f32.mrb[17].mxu0  ;;  %680 = vmatmul.mubr.msk.bf16.gmra.mrb[12].mxu1 %vm412_vm3, %v394_v46 }
 0x10a   : > { %v379_v50 = vpop.f32.mrb[18].mxu0  ;;  %683 = vmatprep.mubr.msk.bf16.mxu1 %vm715_vm0, %v714_v0 }
 0x10b   : > { %v390_v51 = vmax.f32 %v377_v48, 0.0  ;;  %v662_v52 = vpop.f32.mrb[19].mxu0 }
 0x10d   : > { %v395_v53 = vpack.c.bf16 %v390_v51, %v390_v51 }
 0x111   : > { %684 = vmatmul.mubr.msk.bf16.gmra.mrb[16].mxu1 %vm412_vm3, %v395_v53 }
 0x1c4   : > { %v462_v54 = vpop.f32.mrb[0].mxu1 }
 0x1c5   : > { %500 = vst.msk [vmem:[%s248_s9] sm:$0xff] %vm412_vm3, %v462_v54  ;;  %v669_v55 = vpop.f32.mrb[1].mxu1 }
 0x1c6   : > { %v465_v56 = vpop.f32.mrb[2].mxu1 }
 0x1c7   : > { %501 = vst.msk [vmem:[%s248_s9 + $0x8] sm:$0xff] %vm412_vm3, %v465_v56  ;;  %v670_v57 = vpop.f32.mrb[3].mxu1 }
 0x1cc   : > { %v470_v58 = vpop.f32.mrb[4].mxu1 }
 0x1cd   : > { %502 = vst.msk [vmem:[%s248_s9 + $0x10] sm:$0xff] %vm412_vm3, %v470_v58  ;;  %v673_v59 = vpop.f32.mrb[5].mxu1 }
 0x1ce   : > { %v473_v60 = vpop.f32.mrb[6].mxu1 }
 0x1cf   : > { %503 = vst.msk [vmem:[%s248_s9 + $0x18] sm:$0xff] %vm412_vm3, %v473_v60  ;;  %v674_v61 = vpop.f32.mrb[7].mxu1 }
 0x1d4   : > { %v478_v62 = vpop.f32.mrb[8].mxu1 }
 0x1d5   : > { %504 = vst.msk [vmem:[%s248_s9 + $0x20] sm:$0xff] %vm412_vm3, %v478_v62  ;;  %v677_v63 = vpop.f32.mrb[9].mxu1 }
 0x1d6   : > { %v481_v0 = vpop.f32.mrb[10].mxu1 }
 0x1d7   : > { %505 = vst.msk [vmem:[%s248_s9 + $0x28] sm:$0xff] %vm412_vm3, %v481_v0  ;;  %v678_v1 = vpop.f32.mrb[11].mxu1 }
 0x1dc   : > { %v486_v2 = vpop.f32.mrb[12].mxu1 }
 0x1dd   : > { %506 = vst.msk [vmem:[%s248_s9 + $0x30] sm:$0xff] %vm412_vm3, %v486_v2  ;;  %v681_v3 = vpop.f32.mrb[13].mxu1 }
 0x1de   : > { %v489_v4 = vpop.f32.mrb[14].mxu1 }
 0x1df   : > { %507 = vst.msk [vmem:[%s248_s9 + $0x38] sm:$0xff] %vm412_vm3, %v489_v4  ;;  %v682_v5 = vpop.f32.mrb[15].mxu1 }
 0x1e4   : > { %v494_v6 = vpop.f32.mrb[16].mxu1 }
 0x1e5   : > { %508 = vst.msk [vmem:[%s248_s9 + $0x40] sm:$0xff] %vm412_vm3, %v494_v6  ;;  %v685_v7 = vpop.f32.mrb[17].mxu1 }
 0x1e6   : > { %v497_v8 = vpop.f32.mrb[18].mxu1 }
 0x1e7   : > { %v686_v9 = vpop.f32.mrb[19].mxu1 }
 0x1e8 PF: > { %s14_s15 = sadd.s32 1, %s712_s15  }
 0x1e9   : > { %p11_p4 = scmp.ge.s32.totalorder %s14_s15, 6  }
 0x1eb   :  { %13 = sbr.rel (!%p11_p4) target bundleno = 1 (0x1), region = 75 }

</bundles_post_ra>
